<compile_context>
chip_gen: v7x
topology: tpu7x:2x2x1
jax: 0.10.0
libtpu: 0.0.40
codegen_flags: <defaults>
</compile_context>

<pallas_src>
import jax
import jax.numpy as jnp
from jax.experimental import pallas as pl
from jax.experimental.pallas import tpu as pltpu

HIDDEN = 16
LANES = 512            # columns of the 2-D batch slab (multiple of 128)
SUBLANES = 8           # f32 sublane granularity
MAX_TILE_ROWS = 1024   # rows per grid step: 1024 * 512 * 4 B = 2 MiB per block
NUM_PARAMS = 3 * HIDDEN + 1   # w1(16) | b1(16) | w2(16) | b2(1)


def _round_up(a, b):
    return ((a + b - 1) // b) * b


def mlp_kernel(params_ref, x_ref, o_ref):
    # params_ref: SMEM f32[49] = [w1(16) | b1(16) | w2(16) | b2(1)]
    # x_ref     : VMEM f32[TILE_R, LANES]   batch elements, lane/sublane dense
    # o_ref     : VMEM f32[TILE_R, LANES]
    x = x_ref[...]
    # Start the accumulator at the layer-2 bias (scalar splat).
    acc = jnp.full(x.shape, params_ref[3 * HIDDEN], dtype=jnp.float32)
    # Unrolled 16-feature loop: acc += w2_f * relu(w1_f * x + b1_f).
    for f in range(HIDDEN):
        w1_f = params_ref[f]
        b1_f = params_ref[HIDDEN + f]
        w2_f = params_ref[2 * HIDDEN + f]
        acc = acc + w2_f * jnp.maximum(x * w1_f + b1_f, 0.0)
    o_ref[...] = acc.astype(o_ref.dtype)


def todays_model_forward(x, w1, b1, w2, b2):
    """Forward pass matching the PyTorch module.

    x : (N, 1) float32           (PyTorch nn.Linear batch convention)
    w1: (16, 1), b1: (16,)       (parameters of Linear(1, 16))
    w2: (1, 16), b2: (1,)        (parameters of Linear(16, 1))
    returns (N, 1) float32
    """
    n = x.shape[0]
    xf = x.reshape(n).astype(jnp.float32)

    # 2-D slab layout: (rows, LANES), rows a multiple of the row tile.
    rows_needed = pl.cdiv(n, LANES)
    tile_r = max(SUBLANES, min(MAX_TILE_ROWS, _round_up(rows_needed, SUBLANES)))
    rows = _round_up(rows_needed, tile_r)
    n_pad = rows * LANES

    if n_pad != n:  # pad only the tail (padded lanes are sliced off below)
        xf = jnp.pad(xf, (0, n_pad - n))
    x2d = xf.reshape(rows, LANES)

    # Pack all 49 parameters into one flat SMEM array.
    params = jnp.concatenate([
        w1.reshape(HIDDEN).astype(jnp.float32),
        b1.reshape(HIDDEN).astype(jnp.float32),
        w2.reshape(HIDDEN).astype(jnp.float32),
        b2.reshape(1).astype(jnp.float32),
    ])

    grid = (rows // tile_r,)
    out2d = pl.pallas_call(
        mlp_kernel,
        out_shape=jax.ShapeDtypeStruct((rows, LANES), jnp.float32),
        grid=grid,
        in_specs=[
            pl.BlockSpec(memory_space=pltpu.MemorySpace.SMEM),   # params (49 scalars)
            pl.BlockSpec((tile_r, LANES), lambda i: (i, 0)),     # x slab tile
        ],
        out_specs=pl.BlockSpec((tile_r, LANES), lambda i: (i, 0)),
        compiler_params=pltpu.CompilerParams(
            dimension_semantics=("parallel",)),
        cost_estimate=pl.CostEstimate(
            flops=65 * n_pad,
            transcendentals=0,
            bytes_accessed=8 * n_pad + 4 * NUM_PARAMS),
    )(params, x2d)

    y = out2d.reshape(n_pad)
    if n_pad != n:
        y = y[:n]
    return y.reshape(n, 1)


def init_params(key):
    # PyTorch Linear init: U(-1/sqrt(fan_in), 1/sqrt(fan_in)), PyTorch shapes.
    k1, k2, k3, k4 = jax.random.split(key, 4)
    bound1 = 1.0                      # fan_in = 1
    bound2 = 1.0 / jnp.sqrt(16.0)     # fan_in = 16
    w1 = jax.random.uniform(k1, (HIDDEN, 1), jnp.float32, -bound1, bound1)
    b1 = jax.random.uniform(k2, (HIDDEN,), jnp.float32, -bound1, bound1)
    w2 = jax.random.uniform(k3, (1, HIDDEN), jnp.float32, -bound2, bound2)
    b2 = jax.random.uniform(k4, (1,), jnp.float32, -bound2, bound2)
    return w1, b1, w2, b2


if __name__ == "__main__":
    key = jax.random.PRNGKey(0)
    kx, kp = jax.random.split(key)

    batch = 8
    x = jax.random.normal(kx, (batch, 1), jnp.float32)
    w1, b1, w2, b2 = init_params(kp)

    out = jax.block_until_ready(todays_model_forward(x, w1, b1, w2, b2))

    # Reference check in plain JAX (PyTorch convention: y = x @ W.T + b).
    ref = jnp.maximum(x @ w1.T + b1, 0.0) @ w2.T + b2
    assert out.shape == (batch, 1)
    assert jnp.allclose(out, ref, atol=1e-5), "mismatch vs reference"

    print("KERNEL_OK")
</pallas_src>

<mosaic_0001>
module attributes {stable_mosaic.version = 11 : i64} {
  func.func @mlp_kernel(%arg0: i32, %arg1: memref<49xf32, #tpu.memory_space<smem>>, %arg2: memref<8x512xf32, #tpu.memory_space<vmem>>, %arg3: memref<8x512xf32, #tpu.memory_space<vmem>>) attributes {dimension_semantics = [#tpu.dimension_semantics<parallel>], iteration_bounds = array<i64: 1>, scalar_prefetch = 0 : i64, scratch_operands = 0 : i64, tpu.core_type = #tpu.core_type<tc>, window_params = [{transform_indices = @transform_0, window_bounds = array<i64: 49>}, {transform_indices = @transform_1, window_bounds = array<i64: 8, 512>}, {transform_indices = @transform_2, window_bounds = array<i64: 8, 512>}]} {
    %c0 = arith.constant 0 : index
    %c0_0 = arith.constant 0 : index
    %0 = vector.load %arg2[%c0, %c0_0] : memref<8x512xf32, #tpu.memory_space<vmem>>, vector<8x512xf32>
    %c48 = arith.constant 48 : index
    %1 = memref.load %arg1[%c48] : memref<49xf32, #tpu.memory_space<smem>>
    %2 = vector.broadcast %1 : f32 to vector<8x512xf32>
    %c0_1 = arith.constant 0 : index
    %3 = memref.load %arg1[%c0_1] : memref<49xf32, #tpu.memory_space<smem>>
    %c16 = arith.constant 16 : index
    %4 = memref.load %arg1[%c16] : memref<49xf32, #tpu.memory_space<smem>>
    %c32 = arith.constant 32 : index
    %5 = memref.load %arg1[%c32] : memref<49xf32, #tpu.memory_space<smem>>
    %6 = vector.broadcast %3 : f32 to vector<8x512xf32>
    %7 = arith.mulf %0, %6 : vector<8x512xf32>
    %8 = vector.broadcast %4 : f32 to vector<8x512xf32>
    %9 = arith.addf %7, %8 : vector<8x512xf32>
    %cst = arith.constant 0.000000e+00 : f32
    %10 = vector.broadcast %cst : f32 to vector<8x512xf32>
    %11 = arith.maximumf %9, %10 : vector<8x512xf32>
    %12 = vector.broadcast %5 : f32 to vector<8x512xf32>
    %13 = arith.mulf %12, %11 : vector<8x512xf32>
    %14 = arith.addf %2, %13 : vector<8x512xf32>
    %c1 = arith.constant 1 : index
    %15 = memref.load %arg1[%c1] : memref<49xf32, #tpu.memory_space<smem>>
    %c17 = arith.constant 17 : index
    %16 = memref.load %arg1[%c17] : memref<49xf32, #tpu.memory_space<smem>>
    %c33 = arith.constant 33 : index
    %17 = memref.load %arg1[%c33] : memref<49xf32, #tpu.memory_space<smem>>
    %18 = vector.broadcast %15 : f32 to vector<8x512xf32>
    %19 = arith.mulf %0, %18 : vector<8x512xf32>
    %20 = vector.broadcast %16 : f32 to vector<8x512xf32>
    %21 = arith.addf %19, %20 : vector<8x512xf32>
    %cst_2 = arith.constant 0.000000e+00 : f32
    %22 = vector.broadcast %cst_2 : f32 to vector<8x512xf32>
    %23 = arith.maximumf %21, %22 : vector<8x512xf32>
    %24 = vector.broadcast %17 : f32 to vector<8x512xf32>
    %25 = arith.mulf %24, %23 : vector<8x512xf32>
    %26 = arith.addf %14, %25 : vector<8x512xf32>
    %c2 = arith.constant 2 : index
    %27 = memref.load %arg1[%c2] : memref<49xf32, #tpu.memory_space<smem>>
    %c18 = arith.constant 18 : index
    %28 = memref.load %arg1[%c18] : memref<49xf32, #tpu.memory_space<smem>>
    %c34 = arith.constant 34 : index
    %29 = memref.load %arg1[%c34] : memref<49xf32, #tpu.memory_space<smem>>
    %30 = vector.broadcast %27 : f32 to vector<8x512xf32>
    %31 = arith.mulf %0, %30 : vector<8x512xf32>
    %32 = vector.broadcast %28 : f32 to vector<8x512xf32>
    %33 = arith.addf %31, %32 : vector<8x512xf32>
    %cst_3 = arith.constant 0.000000e+00 : f32
    %34 = vector.broadcast %cst_3 : f32 to vector<8x512xf32>
    %35 = arith.maximumf %33, %34 : vector<8x512xf32>
    %36 = vector.broadcast %29 : f32 to vector<8x512xf32>
    %37 = arith.mulf %36, %35 : vector<8x512xf32>
    %38 = arith.addf %26, %37 : vector<8x512xf32>
    %c3 = arith.constant 3 : index
    %39 = memref.load %arg1[%c3] : memref<49xf32, #tpu.memory_space<smem>>
    %c19 = arith.constant 19 : index
    %40 = memref.load %arg1[%c19] : memref<49xf32, #tpu.memory_space<smem>>
    %c35 = arith.constant 35 : index
    %41 = memref.load %arg1[%c35] : memref<49xf32, #tpu.memory_space<smem>>
    %42 = vector.broadcast %39 : f32 to vector<8x512xf32>
    %43 = arith.mulf %0, %42 : vector<8x512xf32>
    %44 = vector.broadcast %40 : f32 to vector<8x512xf32>
    %45 = arith.addf %43, %44 : vector<8x512xf32>
    %cst_4 = arith.constant 0.000000e+00 : f32
    %46 = vector.broadcast %cst_4 : f32 to vector<8x512xf32>
    %47 = arith.maximumf %45, %46 : vector<8x512xf32>
    %48 = vector.broadcast %41 : f32 to vector<8x512xf32>
    %49 = arith.mulf %48, %47 : vector<8x512xf32>
    %50 = arith.addf %38, %49 : vector<8x512xf32>
    %c4 = arith.constant 4 : index
    %51 = memref.load %arg1[%c4] : memref<49xf32, #tpu.memory_space<smem>>
    %c20 = arith.constant 20 : index
    %52 = memref.load %arg1[%c20] : memref<49xf32, #tpu.memory_space<smem>>
    %c36 = arith.constant 36 : index
    %53 = memref.load %arg1[%c36] : memref<49xf32, #tpu.memory_space<smem>>
    %54 = vector.broadcast %51 : f32 to vector<8x512xf32>
    %55 = arith.mulf %0, %54 : vector<8x512xf32>
    %56 = vector.broadcast %52 : f32 to vector<8x512xf32>
    %57 = arith.addf %55, %56 : vector<8x512xf32>
    %cst_5 = arith.constant 0.000000e+00 : f32
    %58 = vector.broadcast %cst_5 : f32 to vector<8x512xf32>
    %59 = arith.maximumf %57, %58 : vector<8x512xf32>
    %60 = vector.broadcast %53 : f32 to vector<8x512xf32>
    %61 = arith.mulf %60, %59 : vector<8x512xf32>
    %62 = arith.addf %50, %61 : vector<8x512xf32>
    %c5 = arith.constant 5 : index
    %63 = memref.load %arg1[%c5] : memref<49xf32, #tpu.memory_space<smem>>
    %c21 = arith.constant 21 : index
    %64 = memref.load %arg1[%c21] : memref<49xf32, #tpu.memory_space<smem>>
    %c37 = arith.constant 37 : index
    %65 = memref.load %arg1[%c37] : memref<49xf32, #tpu.memory_space<smem>>
    %66 = vector.broadcast %63 : f32 to vector<8x512xf32>
    %67 = arith.mulf %0, %66 : vector<8x512xf32>
    %68 = vector.broadcast %64 : f32 to vector<8x512xf32>
    %69 = arith.addf %67, %68 : vector<8x512xf32>
    %cst_6 = arith.constant 0.000000e+00 : f32
    %70 = vector.broadcast %cst_6 : f32 to vector<8x512xf32>
    %71 = arith.maximumf %69, %70 : vector<8x512xf32>
    %72 = vector.broadcast %65 : f32 to vector<8x512xf32>
    %73 = arith.mulf %72, %71 : vector<8x512xf32>
    %74 = arith.addf %62, %73 : vector<8x512xf32>
    %c6 = arith.constant 6 : index
    %75 = memref.load %arg1[%c6] : memref<49xf32, #tpu.memory_space<smem>>
    %c22 = arith.constant 22 : index
    %76 = memref.load %arg1[%c22] : memref<49xf32, #tpu.memory_space<smem>>
    %c38 = arith.constant 38 : index
    %77 = memref.load %arg1[%c38] : memref<49xf32, #tpu.memory_space<smem>>
    %78 = vector.broadcast %75 : f32 to vector<8x512xf32>
    %79 = arith.mulf %0, %78 : vector<8x512xf32>
    %80 = vector.broadcast %76 : f32 to vector<8x512xf32>
    %81 = arith.addf %79, %80 : vector<8x512xf32>
    %cst_7 = arith.constant 0.000000e+00 : f32
    %82 = vector.broadcast %cst_7 : f32 to vector<8x512xf32>
    %83 = arith.maximumf %81, %82 : vector<8x512xf32>
    %84 = vector.broadcast %77 : f32 to vector<8x512xf32>
    %85 = arith.mulf %84, %83 : vector<8x512xf32>
    %86 = arith.addf %74, %85 : vector<8x512xf32>
    %c7 = arith.constant 7 : index
    %87 = memref.load %arg1[%c7] : memref<49xf32, #tpu.memory_space<smem>>
    %c23 = arith.constant 23 : index
    %88 = memref.load %arg1[%c23] : memref<49xf32, #tpu.memory_space<smem>>
    %c39 = arith.constant 39 : index
    %89 = memref.load %arg1[%c39] : memref<49xf32, #tpu.memory_space<smem>>
    %90 = vector.broadcast %87 : f32 to vector<8x512xf32>
    %91 = arith.mulf %0, %90 : vector<8x512xf32>
    %92 = vector.broadcast %88 : f32 to vector<8x512xf32>
    %93 = arith.addf %91, %92 : vector<8x512xf32>
    %cst_8 = arith.constant 0.000000e+00 : f32
    %94 = vector.broadcast %cst_8 : f32 to vector<8x512xf32>
    %95 = arith.maximumf %93, %94 : vector<8x512xf32>
    %96 = vector.broadcast %89 : f32 to vector<8x512xf32>
    %97 = arith.mulf %96, %95 : vector<8x512xf32>
    %98 = arith.addf %86, %97 : vector<8x512xf32>
    %c8 = arith.constant 8 : index
    %99 = memref.load %arg1[%c8] : memref<49xf32, #tpu.memory_space<smem>>
    %c24 = arith.constant 24 : index
    %100 = memref.load %arg1[%c24] : memref<49xf32, #tpu.memory_space<smem>>
    %c40 = arith.constant 40 : index
    %101 = memref.load %arg1[%c40] : memref<49xf32, #tpu.memory_space<smem>>
    %102 = vector.broadcast %99 : f32 to vector<8x512xf32>
    %103 = arith.mulf %0, %102 : vector<8x512xf32>
    %104 = vector.broadcast %100 : f32 to vector<8x512xf32>
    %105 = arith.addf %103, %104 : vector<8x512xf32>
    %cst_9 = arith.constant 0.000000e+00 : f32
    %106 = vector.broadcast %cst_9 : f32 to vector<8x512xf32>
    %107 = arith.maximumf %105, %106 : vector<8x512xf32>
    %108 = vector.broadcast %101 : f32 to vector<8x512xf32>
    %109 = arith.mulf %108, %107 : vector<8x512xf32>
    %110 = arith.addf %98, %109 : vector<8x512xf32>
    %c9 = arith.constant 9 : index
    %111 = memref.load %arg1[%c9] : memref<49xf32, #tpu.memory_space<smem>>
    %c25 = arith.constant 25 : index
    %112 = memref.load %arg1[%c25] : memref<49xf32, #tpu.memory_space<smem>>
    %c41 = arith.constant 41 : index
    %113 = memref.load %arg1[%c41] : memref<49xf32, #tpu.memory_space<smem>>
    %114 = vector.broadcast %111 : f32 to vector<8x512xf32>
    %115 = arith.mulf %0, %114 : vector<8x512xf32>
    %116 = vector.broadcast %112 : f32 to vector<8x512xf32>
    %117 = arith.addf %115, %116 : vector<8x512xf32>
    %cst_10 = arith.constant 0.000000e+00 : f32
    %118 = vector.broadcast %cst_10 : f32 to vector<8x512xf32>
    %119 = arith.maximumf %117, %118 : vector<8x512xf32>
    %120 = vector.broadcast %113 : f32 to vector<8x512xf32>
    %121 = arith.mulf %120, %119 : vector<8x512xf32>
    %122 = arith.addf %110, %121 : vector<8x512xf32>
    %c10 = arith.constant 10 : index
    %123 = memref.load %arg1[%c10] : memref<49xf32, #tpu.memory_space<smem>>
    %c26 = arith.constant 26 : index
    %124 = memref.load %arg1[%c26] : memref<49xf32, #tpu.memory_space<smem>>
    %c42 = arith.constant 42 : index
    %125 = memref.load %arg1[%c42] : memref<49xf32, #tpu.memory_space<smem>>
    %126 = vector.broadcast %123 : f32 to vector<8x512xf32>
    %127 = arith.mulf %0, %126 : vector<8x512xf32>
    %128 = vector.broadcast %124 : f32 to vector<8x512xf32>
    %129 = arith.addf %127, %128 : vector<8x512xf32>
    %cst_11 = arith.constant 0.000000e+00 : f32
    %130 = vector.broadcast %cst_11 : f32 to vector<8x512xf32>
    %131 = arith.maximumf %129, %130 : vector<8x512xf32>
    %132 = vector.broadcast %125 : f32 to vector<8x512xf32>
    %133 = arith.mulf %132, %131 : vector<8x512xf32>
    %134 = arith.addf %122, %133 : vector<8x512xf32>
    %c11 = arith.constant 11 : index
    %135 = memref.load %arg1[%c11] : memref<49xf32, #tpu.memory_space<smem>>
    %c27 = arith.constant 27 : index
    %136 = memref.load %arg1[%c27] : memref<49xf32, #tpu.memory_space<smem>>
    %c43 = arith.constant 43 : index
    %137 = memref.load %arg1[%c43] : memref<49xf32, #tpu.memory_space<smem>>
    %138 = vector.broadcast %135 : f32 to vector<8x512xf32>
    %139 = arith.mulf %0, %138 : vector<8x512xf32>
    %140 = vector.broadcast %136 : f32 to vector<8x512xf32>
    %141 = arith.addf %139, %140 : vector<8x512xf32>
    %cst_12 = arith.constant 0.000000e+00 : f32
    %142 = vector.broadcast %cst_12 : f32 to vector<8x512xf32>
    %143 = arith.maximumf %141, %142 : vector<8x512xf32>
    %144 = vector.broadcast %137 : f32 to vector<8x512xf32>
    %145 = arith.mulf %144, %143 : vector<8x512xf32>
    %146 = arith.addf %134, %145 : vector<8x512xf32>
    %c12 = arith.constant 12 : index
    %147 = memref.load %arg1[%c12] : memref<49xf32, #tpu.memory_space<smem>>
    %c28 = arith.constant 28 : index
    %148 = memref.load %arg1[%c28] : memref<49xf32, #tpu.memory_space<smem>>
    %c44 = arith.constant 44 : index
    %149 = memref.load %arg1[%c44] : memref<49xf32, #tpu.memory_space<smem>>
    %150 = vector.broadcast %147 : f32 to vector<8x512xf32>
    %151 = arith.mulf %0, %150 : vector<8x512xf32>
    %152 = vector.broadcast %148 : f32 to vector<8x512xf32>
    %153 = arith.addf %151, %152 : vector<8x512xf32>
    %cst_13 = arith.constant 0.000000e+00 : f32
    %154 = vector.broadcast %cst_13 : f32 to vector<8x512xf32>
    %155 = arith.maximumf %153, %154 : vector<8x512xf32>
    %156 = vector.broadcast %149 : f32 to vector<8x512xf32>
    %157 = arith.mulf %156, %155 : vector<8x512xf32>
    %158 = arith.addf %146, %157 : vector<8x512xf32>
    %c13 = arith.constant 13 : index
    %159 = memref.load %arg1[%c13] : memref<49xf32, #tpu.memory_space<smem>>
    %c29 = arith.constant 29 : index
    %160 = memref.load %arg1[%c29] : memref<49xf32, #tpu.memory_space<smem>>
    %c45 = arith.constant 45 : index
    %161 = memref.load %arg1[%c45] : memref<49xf32, #tpu.memory_space<smem>>
    %162 = vector.broadcast %159 : f32 to vector<8x512xf32>
    %163 = arith.mulf %0, %162 : vector<8x512xf32>
    %164 = vector.broadcast %160 : f32 to vector<8x512xf32>
    %165 = arith.addf %163, %164 : vector<8x512xf32>
    %cst_14 = arith.constant 0.000000e+00 : f32
    %166 = vector.broadcast %cst_14 : f32 to vector<8x512xf32>
    %167 = arith.maximumf %165, %166 : vector<8x512xf32>
    %168 = vector.broadcast %161 : f32 to vector<8x512xf32>
    %169 = arith.mulf %168, %167 : vector<8x512xf32>
    %170 = arith.addf %158, %169 : vector<8x512xf32>
    %c14 = arith.constant 14 : index
    %171 = memref.load %arg1[%c14] : memref<49xf32, #tpu.memory_space<smem>>
    %c30 = arith.constant 30 : index
    %172 = memref.load %arg1[%c30] : memref<49xf32, #tpu.memory_space<smem>>
    %c46 = arith.constant 46 : index
    %173 = memref.load %arg1[%c46] : memref<49xf32, #tpu.memory_space<smem>>
    %174 = vector.broadcast %171 : f32 to vector<8x512xf32>
    %175 = arith.mulf %0, %174 : vector<8x512xf32>
    %176 = vector.broadcast %172 : f32 to vector<8x512xf32>
    %177 = arith.addf %175, %176 : vector<8x512xf32>
    %cst_15 = arith.constant 0.000000e+00 : f32
    %178 = vector.broadcast %cst_15 : f32 to vector<8x512xf32>
    %179 = arith.maximumf %177, %178 : vector<8x512xf32>
    %180 = vector.broadcast %173 : f32 to vector<8x512xf32>
    %181 = arith.mulf %180, %179 : vector<8x512xf32>
    %182 = arith.addf %170, %181 : vector<8x512xf32>
    %c15 = arith.constant 15 : index
    %183 = memref.load %arg1[%c15] : memref<49xf32, #tpu.memory_space<smem>>
    %c31 = arith.constant 31 : index
    %184 = memref.load %arg1[%c31] : memref<49xf32, #tpu.memory_space<smem>>
    %c47 = arith.constant 47 : index
    %185 = memref.load %arg1[%c47] : memref<49xf32, #tpu.memory_space<smem>>
    %186 = vector.broadcast %183 : f32 to vector<8x512xf32>
    %187 = arith.mulf %0, %186 : vector<8x512xf32>
    %188 = vector.broadcast %184 : f32 to vector<8x512xf32>
    %189 = arith.addf %187, %188 : vector<8x512xf32>
    %cst_16 = arith.constant 0.000000e+00 : f32
    %190 = vector.broadcast %cst_16 : f32 to vector<8x512xf32>
    %191 = arith.maximumf %189, %190 : vector<8x512xf32>
    %192 = vector.broadcast %185 : f32 to vector<8x512xf32>
    %193 = arith.mulf %192, %191 : vector<8x512xf32>
    %194 = arith.addf %182, %193 : vector<8x512xf32>
    %c0_17 = arith.constant 0 : index
    %c0_18 = arith.constant 0 : index
    %195 = vector.load %arg3[%c0_17, %c0_18] : memref<8x512xf32, #tpu.memory_space<vmem>>, vector<8x512xf32>
    tpu.vector_store %arg3[%c0_17, %c0_18], %194 {strides = array<i32>} : memref<8x512xf32, #tpu.memory_space<vmem>>, vector<8x512xf32>,
    return
  }
  func.func @transform_0(%arg0: i32) -> i32 {
    %c0_i32 = arith.constant 0 : i32
    %c0_i32_0 = arith.constant 0 : i32
    return %c0_i32 : i32
  }
  func.func @transform_1(%arg0: i32) -> (i32, i32) {
    %c0_i32 = arith.constant 0 : i32
    %c0_i32_0 = arith.constant 0 : i32
    return %arg0, %c0_i32 : i32, i32
  }
  func.func @transform_2(%arg0: i32) -> (i32, i32) {
    %c0_i32 = arith.constant 0 : i32
    %c0_i32_0 = arith.constant 0 : i32
    return %arg0, %c0_i32 : i32, i32
  }
}

</mosaic_0001>

<bundles_post_ra>
// kernel: tpu_custom_call.1
= control target key start
LH: loop header
LB: loop body
LE: loop exit
PB: predicated region body
PF: predicated region fallthrough
CT: control target
= control target key end

     0   :  { %7 = vsyncpa [#allocation5], 0  ;;  %s834_s0 = inlined_call_operand.hbm [shape: f32[49], index: 0, kind: input, shape index: {}]   ;;  %s835_s1 = inlined_call_operand.hbm [shape: f32[8,512], index: 1, kind: input, shape index: {}]   ;;  %s836_s2 = inlined_call_operand.hbm [shape: f32[8,512], index: 2, kind: output, shape index: {}]  }
   0x1   :  { %8 = vsyncpa [#allocation3], 0 }
   0x2   :  { %9 = vsyncpa [#allocation4], 0  ;;  %s528_s11 = scalar_lea.hbm %s834_s0, 16 }
   0x3   :  { %p529_p0 = scmp.ne.s32.totalorder %s834_s0, %s528_s11  ;;  %p532_p1 = scmp.lt.u32.totalorder %s528_s11, %s834_s0 }
   0x5   :  { %p534_p2 = pnand %p532_p1, %p529_p0 }
   0x7   :  { %537 = shalt.err (!%p534_p2)
}
   0x8   :  { %s588_s16 = smov [#allocation2]   ;;  %s589_s19 = smov [#allocation6]  }
   0x9   :  { %17 = dma.hbm_to_smem %s834_s0, 16, %s588_s16, [#allocation5]  }
   0xa   :  { %s24_s20 = sshll.u32 %s589_s19, 4  ;;  %s538_s23 = scalar_lea.hbm %s835_s1, 512  ;;  %s25_s20 = int_to_ptr.vmem [resolvable:$true] %s24_s20 }
   0xb   :  { %p539_p3 = scmp.ne.s32.totalorder %s835_s1, %s538_s23  ;;  %p542_p4 = scmp.lt.u32.totalorder %s538_s23, %s835_s1 }
   0xd   :  { %p544_p5 = pnand %p542_p4, %p539_p3 }
   0xf   :  { %547 = shalt.err (!%p544_p5)
}
  0x10   :  { %s548_s28 = scalar_lea.vmem %s25_s20, 512  ;;  %p553_p7 = scmp.lt.s32.totalorder %s25_s20, %s25_s20 }
  0x11   :  { %p549_p6 = scmp.ne.s32.totalorder %s25_s20, %s548_s28  ;;  %p554_p8 = scmp.lt.s32.totalorder %s548_s28, %s548_s28 }
  0x13   :  { %p555_p9 = por %p554_p8, %p553_p7 }
  0x15   :  { %p556_p10 = pnand %p555_p9, %p549_p6 }
  0x17   :  { %559 = shalt.err (!%p556_p10)
}
  0x18   :  { %27 = dma.hbm_to_vmem [thread:$0]  %s835_s1, 512, %s25_s20, [#allocation3]  }
  0x19   :  { %582 = dma.done.wait [#allocation5], 16  }
  0x1a   :  { %583 = vsyncadd [#allocation5], 4294967280 }
  0x1b   :  { %584 = dma.done.wait [#allocation3], 512  }
  0x1c   :  { %585 = vsyncadd [#allocation3], 4294966784 }
  0x1d   :  { %34 = sfence }
  0x1e   :  { %s477_s30 = sld [smem:[#allocation2 + $0x30]]  ;;  %s480_s6 = sld [smem:[#allocation2 + $0x1]]  ;;  %v630_v0 = vld [vmem:[#allocation6] sm:$0xff]  ;;  %v632_v1 = vld [vmem:[#allocation6 + $0x8] sm:$0xff]  ;;  %v634_v2 = vld [vmem:[#allocation6 + $0x10] sm:$0xff] }
  0x1f   :  { %s41_s3 = sld [smem:[#allocation2]]  ;;  %s481_s7 = sld [smem:[#allocation2 + $0x11]]  ;;  %v636_v3 = vld [vmem:[#allocation6 + $0x18] sm:$0xff] }
  0x20   :  { %s478_s4 = sld [smem:[#allocation2 + $0x10]]  ;;  %s482_s8 = sld [smem:[#allocation2 + $0x21]] }
  0x21   :  { %s479_s5 = sld [smem:[#allocation2 + $0x20]]  ;;  %s642_s1 = sld [smem:[#allocation2 + $0x2]] }
  0x22   :  { %s644_s9 = sld [smem:[#allocation2 + $0x12]]  ;;  %s648_s11 = sld [smem:[#allocation2 + $0x3]] }
  0x23   :  { %s646_s10 = sld [smem:[#allocation2 + $0x22]]  ;;  %s654_s12 = sld [smem:[#allocation2 + $0x13]] }
  0x24   :  { %v40_v4 = vstv %s477_s30  ;;  %v70_v12 = vstv %s480_s6  ;;  %s656_s13 = sld [smem:[#allocation2 + $0x23]]  ;;  %s658_s14 = sld [smem:[#allocation2 + $0x4]] }
  0x25   :  { %v44_v5 = vstv %s41_s3  ;;  %v75_v13 = vstv %s481_s7  ;;  %v71_v19 = vmul.f32 %v70_v12, %v630_v0  ;;  %v72_v20 = vmul.f32 %v70_v12, %v632_v1  ;;  %s660_s15 = sld [smem:[#allocation2 + $0x14]]  ;;  %s680_s17 = sld [smem:[#allocation2 + $0x5]] }
  0x26   :  { %v49_v6 = vstv %s478_s4  ;;  %v45_v7 = vmul.f32 %v44_v5, %v630_v0  ;;  %v46_v8 = vmul.f32 %v44_v5, %v632_v1  ;;  %v47_v9 = vmul.f32 %v44_v5, %v634_v2  ;;  %s676_s16 = sld [smem:[#allocation2 + $0x24]]  ;;  %s682_s18 = sld [smem:[#allocation2 + $0x15]] }
  0x27   :  { %v48_v10 = vmul.f32 %v44_v5, %v636_v3  ;;  %v58_v11 = vstv %s479_s5  ;;  %v84_v14 = vstv %s482_s8  ;;  %v73_v21 = vmul.f32 %v70_v12, %v634_v2  ;;  %s684_s19 = sld [smem:[#allocation2 + $0x25]]  ;;  %s690_s20 = sld [smem:[#allocation2 + $0x6]] }
  0x28   :  { %v50_v15 = vadd.f32 %v49_v6, %v45_v7  ;;  %v51_v16 = vadd.f32 %v49_v6, %v46_v8  ;;  %v52_v17 = vadd.f32 %v49_v6, %v47_v9  ;;  %v74_v22 = vmul.f32 %v70_v12, %v636_v3  ;;  %s692_s21 = sld [smem:[#allocation2 + $0x16]]  ;;  %s696_s23 = sld [smem:[#allocation2 + $0x7]] }
  0x29   :  { %v53_v18 = vadd.f32 %v49_v6, %v48_v10  ;;  %v76_v27 = vadd.f32 %v75_v13, %v71_v19  ;;  %v77_v28 = vadd.f32 %v75_v13, %v72_v20  ;;  %v78_v29 = vadd.f32 %v75_v13, %v73_v21  ;;  %s694_s22 = sld [smem:[#allocation2 + $0x26]]  ;;  %s706_s24 = sld [smem:[#allocation2 + $0x17]] }
  0x2a   :  { %v54_v23 = vmax.f32 %v50_v15, 0.0  ;;  %v55_v24 = vmax.f32 %v51_v16, 0.0  ;;  %v56_v25 = vmax.f32 %v52_v17, 0.0  ;;  %v79_v30 = vadd.f32 %v75_v13, %v74_v22  ;;  %s708_s25 = sld [smem:[#allocation2 + $0x27]]  ;;  %s710_s26 = sld [smem:[#allocation2 + $0x8]] }
  0x2b   :  { %v57_v26 = vmax.f32 %v53_v18, 0.0  ;;  %v80_v35 = vmax.f32 %v76_v27, 0.0  ;;  %v81_v36 = vmax.f32 %v77_v28, 0.0  ;;  %v82_v37 = vmax.f32 %v78_v29, 0.0  ;;  %s712_s27 = sld [smem:[#allocation2 + $0x18]]  ;;  %s732_s0 = sld [smem:[#allocation2 + $0x9]] }
  0x2c   :  { %v59_v31 = vmul.f32 %v58_v11, %v54_v23  ;;  %v60_v32 = vmul.f32 %v58_v11, %v55_v24  ;;  %v61_v33 = vmul.f32 %v58_v11, %v56_v25  ;;  %v83_v38 = vmax.f32 %v79_v30, 0.0  ;;  %s730_s28 = sld [smem:[#allocation2 + $0x28]]  ;;  %s734_s29 = sld [smem:[#allocation2 + $0x19]] }
  0x2d   :  { %v62_v34 = vmul.f32 %v58_v11, %v57_v26  ;;  %v85_v43 = vmul.f32 %v84_v14, %v80_v35  ;;  %v86_v44 = vmul.f32 %v84_v14, %v81_v36  ;;  %v87_v45 = vmul.f32 %v84_v14, %v82_v37  ;;  %s736_s30 = sld [smem:[#allocation2 + $0x29]]  ;;  %s742_s3 = sld [smem:[#allocation2 + $0xa]] }
  0x2e   :  { %v63_v39 = vadd.f32 %v59_v31, %v40_v4  ;;  %v64_v40 = vadd.f32 %v60_v32, %v40_v4  ;;  %v65_v41 = vadd.f32 %v61_v33, %v40_v4  ;;  %v88_v46 = vmul.f32 %v84_v14, %v83_v38  ;;  %s744_s4 = sld [smem:[#allocation2 + $0x1a]]  ;;  %s748_s6 = sld [smem:[#allocation2 + $0xb]] }
  0x2f   :  { %v66_v42 = vadd.f32 %v62_v34, %v40_v4  ;;  %v96_v47 = vstv %s642_s1  ;;  %v101_v48 = vstv %s644_s9  ;;  %v110_v49 = vstv %s646_s10  ;;  %s746_s5 = sld [smem:[#allocation2 + $0x2a]]  ;;  %s758_s7 = sld [smem:[#allocation2 + $0x1b]] }
  0x30   :  { %v122_v50 = vstv %s648_s11  ;;  %v89_v51 = vadd.f32 %v85_v43, %v63_v39  ;;  %v90_v52 = vadd.f32 %v86_v44, %v64_v40  ;;  %v91_v53 = vadd.f32 %v87_v45, %v65_v41  ;;  %s763_s8 = sld [smem:[#allocation2 + $0x2b]]  ;;  %s766_s1 = sld [smem:[#allocation2 + $0xc]] }
  0x31   :  { %v92_v54 = vadd.f32 %v88_v46, %v66_v42  ;;  %v97_v55 = vmul.f32 %v96_v47, %v630_v0  ;;  %v98_v56 = vmul.f32 %v96_v47, %v632_v1  ;;  %v99_v57 = vmul.f32 %v96_v47, %v634_v2  ;;  %s768_s9 = sld [smem:[#allocation2 + $0x1c]]  ;;  %s784_s11 = sld [smem:[#allocation2 + $0xd]] }
  0x32   :  { %v100_v58 = vmul.f32 %v96_v47, %v636_v3  ;;  %v123_v59 = vmul.f32 %v122_v50, %v630_v0  ;;  %v124_v60 = vmul.f32 %v122_v50, %v632_v1  ;;  %v125_v61 = vmul.f32 %v122_v50, %v634_v2  ;;  %s780_s10 = sld [smem:[#allocation2 + $0x2c]] }
  0x33   :  { %v126_v62 = vmul.f32 %v122_v50, %v636_v3  ;;  %v102_v63 = vadd.f32 %v101_v48, %v97_v55  ;;  %v103_v4 = vadd.f32 %v101_v48, %v98_v56  ;;  %v104_v5 = vadd.f32 %v101_v48, %v99_v57 }
  0x34   :  { %v105_v6 = vadd.f32 %v101_v48, %v100_v58  ;;  %v127_v7 = vstv %s654_s12  ;;  %v136_v8 = vstv %s656_s13  ;;  %v148_v9 = vstv %s658_s14  ;;  %s786_s12 = sld [smem:[#allocation2 + $0x1d]]  ;;  %s794_s14 = sld [smem:[#allocation2 + $0xe]] }
  0x35   :  { %v153_v10 = vstv %s660_s15  ;;  %v106_v11 = vmax.f32 %v102_v63, 0.0  ;;  %v107_v12 = vmax.f32 %v103_v4, 0.0  ;;  %v108_v13 = vmax.f32 %v104_v5, 0.0  ;;  %s788_s13 = sld [smem:[#allocation2 + $0x2d]]  ;;  %s796_s15 = sld [smem:[#allocation2 + $0x1e]] }
  0x36   :  { %v109_v14 = vmax.f32 %v105_v6, 0.0  ;;  %v128_v15 = vadd.f32 %v127_v7, %v123_v59  ;;  %v129_v16 = vadd.f32 %v127_v7, %v124_v60  ;;  %v130_v17 = vadd.f32 %v127_v7, %v125_v61 }
  0x37   :  { %v131_v18 = vadd.f32 %v127_v7, %v126_v62  ;;  %v111_v19 = vmul.f32 %v110_v49, %v106_v11  ;;  %v112_v20 = vmul.f32 %v110_v49, %v107_v12  ;;  %v113_v21 = vmul.f32 %v110_v49, %v108_v13 }
  0x38   :  { %v114_v22 = vmul.f32 %v110_v49, %v109_v14  ;;  %v132_v23 = vmax.f32 %v128_v15, 0.0  ;;  %v133_v24 = vmax.f32 %v129_v16, 0.0  ;;  %v134_v25 = vmax.f32 %v130_v17, 0.0 }
  0x39   :  { %v135_v26 = vmax.f32 %v131_v18, 0.0  ;;  %v115_v27 = vadd.f32 %v111_v19, %v89_v51  ;;  %v116_v28 = vadd.f32 %v112_v20, %v90_v52  ;;  %v117_v29 = vadd.f32 %v113_v21, %v91_v53 }
  0x3a   :  { %v118_v30 = vadd.f32 %v114_v22, %v92_v54  ;;  %v137_v31 = vmul.f32 %v136_v8, %v132_v23  ;;  %v138_v32 = vmul.f32 %v136_v8, %v133_v24  ;;  %v139_v33 = vmul.f32 %v136_v8, %v134_v25 }
  0x3b   :  { %v140_v34 = vmul.f32 %v136_v8, %v135_v26  ;;  %v149_v35 = vmul.f32 %v148_v9, %v630_v0  ;;  %v150_v36 = vmul.f32 %v148_v9, %v632_v1  ;;  %v151_v37 = vmul.f32 %v148_v9, %v634_v2 }
  0x3c   :  { %v152_v38 = vmul.f32 %v148_v9, %v636_v3  ;;  %v141_v39 = vadd.f32 %v137_v31, %v115_v27  ;;  %v142_v40 = vadd.f32 %v138_v32, %v116_v28  ;;  %v143_v41 = vadd.f32 %v139_v33, %v117_v29 }
  0x3d   :  { %v144_v42 = vadd.f32 %v140_v34, %v118_v30  ;;  %v154_v43 = vadd.f32 %v153_v10, %v149_v35  ;;  %v155_v44 = vadd.f32 %v153_v10, %v150_v36  ;;  %v156_v45 = vadd.f32 %v153_v10, %v151_v37 }
  0x3e   :  { %v157_v46 = vadd.f32 %v153_v10, %v152_v38  ;;  %v162_v47 = vstv %s676_s16  ;;  %v174_v48 = vstv %s680_s17  ;;  %v179_v49 = vstv %s682_s18  ;;  %s798_s16 = sld [smem:[#allocation2 + $0x2e]]  ;;  %s800_s17 = sld [smem:[#allocation2 + $0xf]] }
  0x3f   :  { %v188_v50 = vstv %s684_s19  ;;  %v158_v51 = vmax.f32 %v154_v43, 0.0  ;;  %v159_v52 = vmax.f32 %v155_v44, 0.0  ;;  %v160_v53 = vmax.f32 %v156_v45, 0.0  ;;  %s523_s18 = sld [smem:[#allocation2 + $0x1f]] }
  0x40   :  { %v161_v54 = vmax.f32 %v157_v46, 0.0  ;;  %v175_v55 = vmul.f32 %v174_v48, %v630_v0  ;;  %v176_v56 = vmul.f32 %v174_v48, %v632_v1  ;;  %v177_v57 = vmul.f32 %v174_v48, %v634_v2  ;;  %s524_s19 = sld [smem:[#allocation2 + $0x2f]] }
  0x41   :  { %v178_v58 = vmul.f32 %v174_v48, %v636_v3  ;;  %v163_v59 = vmul.f32 %v162_v47, %v158_v51  ;;  %v164_v60 = vmul.f32 %v162_v47, %v159_v52  ;;  %v165_v61 = vmul.f32 %v162_v47, %v160_v53 }
  0x42   :  { %v166_v62 = vmul.f32 %v162_v47, %v161_v54  ;;  %v180_v63 = vadd.f32 %v179_v49, %v175_v55  ;;  %v181_v4 = vadd.f32 %v179_v49, %v176_v56  ;;  %v182_v5 = vadd.f32 %v179_v49, %v177_v57 }
  0x43   :  { %v183_v6 = vadd.f32 %v179_v49, %v178_v58  ;;  %v167_v7 = vadd.f32 %v163_v59, %v141_v39  ;;  %v168_v8 = vadd.f32 %v164_v60, %v142_v40  ;;  %v169_v9 = vadd.f32 %v165_v61, %v143_v41 }
  0x44   :  { %v170_v10 = vadd.f32 %v166_v62, %v144_v42  ;;  %v184_v11 = vmax.f32 %v180_v63, 0.0  ;;  %v185_v12 = vmax.f32 %v181_v4, 0.0  ;;  %v186_v13 = vmax.f32 %v182_v5, 0.0 }
  0x45   :  { %v187_v14 = vmax.f32 %v183_v6, 0.0  ;;  %v200_v15 = vstv %s690_s20  ;;  %v205_v16 = vstv %s692_s21  ;;  %v214_v17 = vstv %s694_s22  ;;  %s590_s20 = smov [#allocation7]  }
  0x46   :  { %v226_v18 = vstv %s696_s23  ;;  %v189_v19 = vmul.f32 %v188_v50, %v184_v11  ;;  %v190_v20 = vmul.f32 %v188_v50, %v185_v12  ;;  %v191_v21 = vmul.f32 %v188_v50, %v186_v13  ;;  %s467_s21 = sshll.u32 %s590_s20, 4  ;;  %s468_s21 = int_to_ptr.vmem [resolvable:$true] %s467_s21 }
  0x47   :  { %v192_v22 = vmul.f32 %v188_v50, %v187_v14  ;;  %v201_v23 = vmul.f32 %v200_v15, %v630_v0  ;;  %v202_v24 = vmul.f32 %v200_v15, %v632_v1  ;;  %v203_v25 = vmul.f32 %v200_v15, %v634_v2  ;;  %s560_s22 = scalar_lea.vmem %s468_s21, 512  ;;  %p565_p12 = scmp.lt.s32.totalorder %s468_s21, %s468_s21 }
  0x48   :  { %v204_v26 = vmul.f32 %v200_v15, %v636_v3  ;;  %v193_v27 = vadd.f32 %v189_v19, %v167_v7  ;;  %v194_v28 = vadd.f32 %v190_v20, %v168_v8  ;;  %v195_v29 = vadd.f32 %v191_v21, %v169_v9  ;;  %p561_p11 = scmp.ne.s32.totalorder %s468_s21, %s560_s22  ;;  %p566_p13 = scmp.lt.s32.totalorder %s560_s22, %s560_s22 }
  0x49   :  { %v196_v30 = vadd.f32 %v192_v22, %v170_v10  ;;  %v206_v31 = vadd.f32 %v205_v16, %v201_v23  ;;  %v207_v32 = vadd.f32 %v205_v16, %v202_v24  ;;  %v208_v33 = vadd.f32 %v205_v16, %v203_v25 }
  0x4a   :  { %v209_v34 = vadd.f32 %v205_v16, %v204_v26  ;;  %v227_v35 = vmul.f32 %v226_v18, %v630_v0  ;;  %v228_v36 = vmul.f32 %v226_v18, %v632_v1  ;;  %v229_v37 = vmul.f32 %v226_v18, %v634_v2  ;;  %p567_p0 = por %p566_p13, %p565_p12 }
  0x4b   :  { %v230_v38 = vmul.f32 %v226_v18, %v636_v3  ;;  %v210_v39 = vmax.f32 %v206_v31, 0.0  ;;  %v211_v40 = vmax.f32 %v207_v32, 0.0  ;;  %v212_v41 = vmax.f32 %v208_v33, 0.0 }
  0x4c   :  { %v213_v42 = vmax.f32 %v209_v34, 0.0  ;;  %v231_v43 = vstv %s706_s24  ;;  %v240_v44 = vstv %s708_s25  ;;  %v252_v45 = vstv %s710_s26  ;;  %p568_p1 = pnand %p567_p0, %p561_p11 }
  0x4d   :  { %v257_v46 = vstv %s712_s27  ;;  %v215_v47 = vmul.f32 %v214_v17, %v210_v39  ;;  %v216_v48 = vmul.f32 %v214_v17, %v211_v40  ;;  %v217_v49 = vmul.f32 %v214_v17, %v212_v41 }
  0x4e   :  { %v218_v50 = vmul.f32 %v214_v17, %v213_v42  ;;  %v232_v51 = vadd.f32 %v231_v43, %v227_v35  ;;  %v233_v52 = vadd.f32 %v231_v43, %v228_v36  ;;  %v234_v53 = vadd.f32 %v231_v43, %v229_v37 }
  0x4f   :  { %v235_v54 = vadd.f32 %v231_v43, %v230_v38  ;;  %v219_v55 = vadd.f32 %v215_v47, %v193_v27  ;;  %v220_v56 = vadd.f32 %v216_v48, %v194_v28  ;;  %v221_v57 = vadd.f32 %v217_v49, %v195_v29 }
  0x50   :  { %v222_v58 = vadd.f32 %v218_v50, %v196_v30  ;;  %v236_v59 = vmax.f32 %v232_v51, 0.0  ;;  %v237_v60 = vmax.f32 %v233_v52, 0.0  ;;  %v238_v61 = vmax.f32 %v234_v53, 0.0 }
  0x51   :  { %v239_v62 = vmax.f32 %v235_v54, 0.0  ;;  %v253_v63 = vmul.f32 %v252_v45, %v630_v0  ;;  %v254_v4 = vmul.f32 %v252_v45, %v632_v1  ;;  %v255_v5 = vmul.f32 %v252_v45, %v634_v2 }
  0x52   :  { %v256_v6 = vmul.f32 %v252_v45, %v636_v3  ;;  %v241_v7 = vmul.f32 %v240_v44, %v236_v59  ;;  %v242_v8 = vmul.f32 %v240_v44, %v237_v60  ;;  %v243_v9 = vmul.f32 %v240_v44, %v238_v61 }
  0x53   :  { %v244_v10 = vmul.f32 %v240_v44, %v239_v62  ;;  %v258_v11 = vadd.f32 %v257_v46, %v253_v63  ;;  %v259_v12 = vadd.f32 %v257_v46, %v254_v4  ;;  %v260_v13 = vadd.f32 %v257_v46, %v255_v5 }
  0x54   :  { %v261_v14 = vadd.f32 %v257_v46, %v256_v6  ;;  %v245_v15 = vadd.f32 %v241_v7, %v219_v55  ;;  %v246_v16 = vadd.f32 %v242_v8, %v220_v56  ;;  %v247_v17 = vadd.f32 %v243_v9, %v221_v57 }
  0x55   :  { %v248_v18 = vadd.f32 %v244_v10, %v222_v58  ;;  %v262_v19 = vmax.f32 %v258_v11, 0.0  ;;  %v263_v20 = vmax.f32 %v259_v12, 0.0  ;;  %v264_v21 = vmax.f32 %v260_v13, 0.0 }
  0x56   :  { %v265_v22 = vmax.f32 %v261_v14, 0.0  ;;  %v266_v23 = vstv %s730_s28  ;;  %v278_v24 = vstv %s732_s0  ;;  %v283_v25 = vstv %s734_s29 }
  0x57   :  { %v292_v26 = vstv %s736_s30  ;;  %v267_v27 = vmul.f32 %v266_v23, %v262_v19  ;;  %v268_v28 = vmul.f32 %v266_v23, %v263_v20  ;;  %v269_v29 = vmul.f32 %v266_v23, %v264_v21 }
  0x58   :  { %v270_v30 = vmul.f32 %v266_v23, %v265_v22  ;;  %v279_v31 = vmul.f32 %v278_v24, %v630_v0  ;;  %v280_v32 = vmul.f32 %v278_v24, %v632_v1  ;;  %v281_v33 = vmul.f32 %v278_v24, %v634_v2 }
  0x59   :  { %v282_v34 = vmul.f32 %v278_v24, %v636_v3  ;;  %v271_v35 = vadd.f32 %v267_v27, %v245_v15  ;;  %v272_v36 = vadd.f32 %v268_v28, %v246_v16  ;;  %v273_v37 = vadd.f32 %v269_v29, %v247_v17 }
  0x5a   :  { %v274_v38 = vadd.f32 %v270_v30, %v248_v18  ;;  %v284_v39 = vadd.f32 %v283_v25, %v279_v31  ;;  %v285_v40 = vadd.f32 %v283_v25, %v280_v32  ;;  %v286_v41 = vadd.f32 %v283_v25, %v281_v33 }
  0x5b   :  { %v287_v42 = vadd.f32 %v283_v25, %v282_v34  ;;  %v304_v43 = vstv %s742_s3  ;;  %v309_v44 = vstv %s744_s4  ;;  %v318_v45 = vstv %s746_s5 }
  0x5c   :  { %v330_v46 = vstv %s748_s6  ;;  %v288_v47 = vmax.f32 %v284_v39, 0.0  ;;  %v289_v48 = vmax.f32 %v285_v40, 0.0  ;;  %v290_v49 = vmax.f32 %v286_v41, 0.0 }
  0x5d   :  { %v291_v50 = vmax.f32 %v287_v42, 0.0  ;;  %v305_v51 = vmul.f32 %v304_v43, %v630_v0  ;;  %v306_v52 = vmul.f32 %v304_v43, %v632_v1  ;;  %v307_v53 = vmul.f32 %v304_v43, %v634_v2 }
  0x5e   :  { %v308_v54 = vmul.f32 %v304_v43, %v636_v3  ;;  %v293_v55 = vmul.f32 %v292_v26, %v288_v47  ;;  %v294_v56 = vmul.f32 %v292_v26, %v289_v48  ;;  %v295_v57 = vmul.f32 %v292_v26, %v290_v49 }
  0x5f   :  { %v296_v58 = vmul.f32 %v292_v26, %v291_v50  ;;  %v310_v59 = vadd.f32 %v309_v44, %v305_v51  ;;  %v311_v60 = vadd.f32 %v309_v44, %v306_v52  ;;  %v312_v61 = vadd.f32 %v309_v44, %v307_v53 }
  0x60   :  { %v313_v62 = vadd.f32 %v309_v44, %v308_v54  ;;  %v297_v63 = vadd.f32 %v293_v55, %v271_v35  ;;  %v298_v4 = vadd.f32 %v294_v56, %v272_v36  ;;  %v299_v5 = vadd.f32 %v295_v57, %v273_v37 }
  0x61   :  { %v300_v6 = vadd.f32 %v296_v58, %v274_v38  ;;  %v314_v7 = vmax.f32 %v310_v59, 0.0  ;;  %v315_v8 = vmax.f32 %v311_v60, 0.0  ;;  %v316_v9 = vmax.f32 %v312_v61, 0.0 }
  0x62   :  { %v317_v10 = vmax.f32 %v313_v62, 0.0  ;;  %v331_v11 = vmul.f32 %v330_v46, %v630_v0  ;;  %v332_v12 = vmul.f32 %v330_v46, %v632_v1  ;;  %v333_v13 = vmul.f32 %v330_v46, %v634_v2 }
  0x63   :  { %v334_v14 = vmul.f32 %v330_v46, %v636_v3  ;;  %v319_v15 = vmul.f32 %v318_v45, %v314_v7  ;;  %v320_v16 = vmul.f32 %v318_v45, %v315_v8  ;;  %v321_v17 = vmul.f32 %v318_v45, %v316_v9 }
  0x64   :  { %v322_v18 = vmul.f32 %v318_v45, %v317_v10  ;;  %v335_v19 = vstv %s758_s7  ;;  %v344_v20 = vstv %s763_s8  ;;  %v356_v21 = vstv %s766_s1 }
  0x65   :  { %v361_v22 = vstv %s768_s9  ;;  %v323_v23 = vadd.f32 %v319_v15, %v297_v63  ;;  %v324_v24 = vadd.f32 %v320_v16, %v298_v4  ;;  %v325_v25 = vadd.f32 %v321_v17, %v299_v5 }
  0x66   :  { %v326_v26 = vadd.f32 %v322_v18, %v300_v6  ;;  %v336_v27 = vadd.f32 %v335_v19, %v331_v11  ;;  %v337_v28 = vadd.f32 %v335_v19, %v332_v12  ;;  %v338_v29 = vadd.f32 %v335_v19, %v333_v13 }
  0x67   :  { %v339_v30 = vadd.f32 %v335_v19, %v334_v14  ;;  %v357_v31 = vmul.f32 %v356_v21, %v630_v0  ;;  %v358_v32 = vmul.f32 %v356_v21, %v632_v1  ;;  %v359_v33 = vmul.f32 %v356_v21, %v634_v2 }
  0x68   :  { %v360_v34 = vmul.f32 %v356_v21, %v636_v3  ;;  %v340_v35 = vmax.f32 %v336_v27, 0.0  ;;  %v341_v36 = vmax.f32 %v337_v28, 0.0  ;;  %v342_v37 = vmax.f32 %v338_v29, 0.0 }
  0x69   :  { %v343_v38 = vmax.f32 %v339_v30, 0.0  ;;  %v362_v39 = vadd.f32 %v361_v22, %v357_v31  ;;  %v363_v40 = vadd.f32 %v361_v22, %v358_v32  ;;  %v364_v41 = vadd.f32 %v361_v22, %v359_v33 }
  0x6a   :  { %v365_v42 = vadd.f32 %v361_v22, %v360_v34  ;;  %v345_v43 = vmul.f32 %v344_v20, %v340_v35  ;;  %v346_v44 = vmul.f32 %v344_v20, %v341_v36  ;;  %v347_v45 = vmul.f32 %v344_v20, %v342_v37 }
  0x6b   :  { %v348_v46 = vmul.f32 %v344_v20, %v343_v38  ;;  %v366_v47 = vmax.f32 %v362_v39, 0.0  ;;  %v367_v48 = vmax.f32 %v363_v40, 0.0  ;;  %v368_v49 = vmax.f32 %v364_v41, 0.0 }
  0x6c   :  { %v369_v50 = vmax.f32 %v365_v42, 0.0  ;;  %v349_v51 = vadd.f32 %v345_v43, %v323_v23  ;;  %v350_v52 = vadd.f32 %v346_v44, %v324_v24  ;;  %v351_v53 = vadd.f32 %v347_v45, %v325_v25 }
  0x6d   :  { %v352_v54 = vadd.f32 %v348_v46, %v326_v26  ;;  %v370_v55 = vstv %s780_s10  ;;  %v382_v56 = vstv %s784_s11  ;;  %v387_v57 = vstv %s786_s12 }
  0x6e   :  { %v396_v58 = vstv %s788_s13  ;;  %v371_v59 = vmul.f32 %v370_v55, %v366_v47  ;;  %v372_v60 = vmul.f32 %v370_v55, %v367_v48  ;;  %v373_v61 = vmul.f32 %v370_v55, %v368_v49 }
  0x6f   :  { %v374_v62 = vmul.f32 %v370_v55, %v369_v50  ;;  %v383_v63 = vmul.f32 %v382_v56, %v630_v0  ;;  %v384_v4 = vmul.f32 %v382_v56, %v632_v1  ;;  %v385_v5 = vmul.f32 %v382_v56, %v634_v2 }
  0x70   :  { %v386_v6 = vmul.f32 %v382_v56, %v636_v3  ;;  %v375_v7 = vadd.f32 %v371_v59, %v349_v51  ;;  %v376_v8 = vadd.f32 %v372_v60, %v350_v52  ;;  %v377_v9 = vadd.f32 %v373_v61, %v351_v53 }
  0x71   :  { %v378_v10 = vadd.f32 %v374_v62, %v352_v54  ;;  %v388_v11 = vadd.f32 %v387_v57, %v383_v63  ;;  %v389_v12 = vadd.f32 %v387_v57, %v384_v4  ;;  %v390_v13 = vadd.f32 %v387_v57, %v385_v5 }
  0x72   :  { %v391_v14 = vadd.f32 %v387_v57, %v386_v6  ;;  %v408_v15 = vstv %s794_s14  ;;  %v413_v16 = vstv %s796_s15  ;;  %v422_v17 = vstv %s798_s16 }
  0x73   :  { %v434_v18 = vstv %s800_s17  ;;  %v392_v19 = vmax.f32 %v388_v11, 0.0  ;;  %v393_v20 = vmax.f32 %v389_v12, 0.0  ;;  %v394_v21 = vmax.f32 %v390_v13, 0.0 }
  0x74   :  { %v395_v22 = vmax.f32 %v391_v14, 0.0  ;;  %v409_v23 = vmul.f32 %v408_v15, %v630_v0  ;;  %v410_v24 = vmul.f32 %v408_v15, %v632_v1  ;;  %v411_v25 = vmul.f32 %v408_v15, %v634_v2 }
  0x75   :  { %v412_v26 = vmul.f32 %v408_v15, %v636_v3  ;;  %v397_v27 = vmul.f32 %v396_v58, %v392_v19  ;;  %v398_v28 = vmul.f32 %v396_v58, %v393_v20  ;;  %v399_v29 = vmul.f32 %v396_v58, %v394_v21 }
  0x76   :  { %v400_v30 = vmul.f32 %v396_v58, %v395_v22  ;;  %v414_v31 = vadd.f32 %v413_v16, %v409_v23  ;;  %v415_v32 = vadd.f32 %v413_v16, %v410_v24  ;;  %v416_v33 = vadd.f32 %v413_v16, %v411_v25 }
  0x77   :  { %v417_v34 = vadd.f32 %v413_v16, %v412_v26  ;;  %v401_v35 = vadd.f32 %v397_v27, %v375_v7  ;;  %v402_v36 = vadd.f32 %v398_v28, %v376_v8  ;;  %v403_v37 = vadd.f32 %v399_v29, %v377_v9 }
  0x78   :  { %v404_v38 = vadd.f32 %v400_v30, %v378_v10  ;;  %v418_v39 = vmax.f32 %v414_v31, 0.0  ;;  %v419_v40 = vmax.f32 %v415_v32, 0.0  ;;  %v420_v41 = vmax.f32 %v416_v33, 0.0 }
  0x79   :  { %v421_v42 = vmax.f32 %v417_v34, 0.0  ;;  %v435_v43 = vmul.f32 %v434_v18, %v630_v0  ;;  %v436_v44 = vmul.f32 %v434_v18, %v632_v1  ;;  %v437_v45 = vmul.f32 %v434_v18, %v634_v2 }
  0x7a   :  { %v438_v46 = vmul.f32 %v434_v18, %v636_v3  ;;  %v423_v47 = vmul.f32 %v422_v17, %v418_v39  ;;  %v424_v48 = vmul.f32 %v422_v17, %v419_v40  ;;  %v425_v49 = vmul.f32 %v422_v17, %v420_v41 }
  0x7b   :  { %v426_v50 = vmul.f32 %v422_v17, %v421_v42  ;;  %v439_v51 = vstv %s523_s18  ;;  %v448_v52 = vstv %s524_s19 }
  0x7c   :  { %v440_v53 = vadd.f32 %v439_v51, %v435_v43  ;;  %v441_v54 = vadd.f32 %v439_v51, %v436_v44  ;;  %v442_v55 = vadd.f32 %v439_v51, %v437_v45  ;;  %v443_v56 = vadd.f32 %v439_v51, %v438_v46 }
  0x7d   :  { %v427_v57 = vadd.f32 %v423_v47, %v401_v35  ;;  %v428_v58 = vadd.f32 %v424_v48, %v402_v36  ;;  %v429_v59 = vadd.f32 %v425_v49, %v403_v37  ;;  %v430_v0 = vadd.f32 %v426_v50, %v404_v38 }
  0x7e   :  { %v444_v60 = vmax.f32 %v440_v53, 0.0  ;;  %v445_v1 = vmax.f32 %v441_v54, 0.0  ;;  %v446_v61 = vmax.f32 %v442_v55, 0.0  ;;  %v447_v2 = vmax.f32 %v443_v56, 0.0 }
  0x80   :  { %v449_v3 = vmul.f32 %v448_v52, %v444_v60  ;;  %v450_v62 = vmul.f32 %v448_v52, %v445_v1  ;;  %v451_v63 = vmul.f32 %v448_v52, %v446_v61  ;;  %v452_v4 = vmul.f32 %v448_v52, %v447_v2 }
  0x82   :  { %v453_v5 = vadd.f32 %v449_v3, %v427_v57  ;;  %v454_v6 = vadd.f32 %v450_v62, %v428_v58  ;;  %v455_v7 = vadd.f32 %v451_v63, %v429_v59  ;;  %v456_v8 = vadd.f32 %v452_v4, %v430_v0 }
  0x84   :  { %457 = vst [vmem:[#allocation7] sm:$0xff] %v453_v5  ;;  %458 = vst [vmem:[#allocation7 + $0x8] sm:$0xff] %v454_v6 }
  0x85   :  { %459 = vst [vmem:[#allocation7 + $0x10] sm:$0xff] %v455_v7  ;;  %460 = vst [vmem:[#allocation7 + $0x18] sm:$0xff] %v456_v8 }
  0x86   :  { %571 = shalt.err (!%p568_p1)
}
  0x87   :  { %s572_s25 = scalar_lea.hbm %s836_s2, 512 }
  0x88   :  { %p573_p2 = scmp.ne.s32.totalorder %s836_s2, %s572_s25  ;;  %p576_p3 = scmp.lt.u32.totalorder %s572_s25, %s836_s2 }
  0x8a   :  { %p578_p4 = pnand %p576_p3, %p573_p2 }
  0x8c   :  { %581 = shalt.err (!%p578_p4)
}
  0x8d   :  { %470 = dma.vmem_to_hbm [thread:$0]  %s468_s21, 512, %s836_s2, [#allocation4]  }
  0x8e   :  { %586 = dma.done.wait [#allocation4], 512  }
  0x8f   :  { %587 = vsyncadd [#allocation4], 4294966784 }
  0x90   :  { %474 = vsyncpa [#allocation3], 1 }
  0x91   :  { %475 = vsyncpa [#allocation4], 1 }
  0x92   :  { %476 = vsyncpa [#allocation5], 1 }

</bundles_post_ra>
